<compile_context>
chip_gen: v6e
topology: v6e:2x2x1
jax: 0.10.0
libtpu: 0.0.40
codegen_flags: <defaults>
</compile_context>

<pallas_src>
import jax
import jax.numpy as jnp
from jax import lax
from jax.experimental import pallas as pl
from jax.experimental.pallas import tpu as pltpu


# ----------------------------- kernels ------------------------------------ #

def _mix_images_kernel(lam_ref, x_ref, x_roll_ref, out_ref):
    """One grid step = one lane-dense (1, TR, TN) chunk of one sample."""
    lam = lam_ref[0]                                   # f32 scalar in SMEM
    x = x_ref[...].astype(jnp.float32)
    xr = x_roll_ref[...].astype(jnp.float32)
    out_ref[...] = (lam * x + (1.0 - lam) * xr).astype(out_ref.dtype)


def _mix_targets_kernel(lam_ref, tgt_ref, tgt_roll_ref, out_ref):
    """Single-step kernel: one-hot encode targets and blend them."""
    lam = lam_ref[0]
    B, K = out_ref.shape
    classes = lax.broadcasted_iota(jnp.int32, (B, K), 1)
    oh = (classes == tgt_ref[...]).astype(jnp.float32)        # (B, K)
    oh_r = (classes == tgt_roll_ref[...]).astype(jnp.float32)
    out_ref[...] = (lam * oh + (1.0 - lam) * oh_r).astype(out_ref.dtype)


# ----------------------------- tiling helper ------------------------------ #

def _choose_image_tiling(n, itemsize, target_block_bytes=1 << 20, max_lanes=8192):
    """Pick (TN, R, TR): batch is reshaped to (B, R, TN) with N = R * TN.

    TN is the largest multiple of 128 dividing N (capped), so stores are
    lane-dense; TR is a multiple of 8 dividing R sized near the byte target
    (fallback: full R, which is always a legal block extent)."""
    tn = n
    start = (min(n, max_lanes) // 128) * 128
    for cand in range(start, 0, -128):
        if n % cand == 0:
            tn = cand
            break
    r = n // tn
    tr = r
    want = max(1, target_block_bytes // (tn * itemsize))
    cand = (min(want, r) // 8) * 8
    while cand >= 8:
        if r % cand == 0:
            tr = cand
            break
        cand -= 8
    return tn, r, tr


# ----------------------------- public wrapper ------------------------------ #

def random_mixup(batch, target, key, *, num_classes, p=0.5, alpha=1.0):
    """Pallas implementation of RandomMixUp.forward.

    batch:  float tensor (B, C, H, W)
    target: integer tensor (B,)   (torch uses int64; int32 accepted here)
    Returns (mixed_batch, mixed_one_hot_target).
    """
    if num_classes < 1:
        raise ValueError(f"Please provide a valid positive value for the "
                         f"num_classes. Got num_classes={num_classes}")
    if alpha <= 0:
        raise ValueError("Alpha param can't be zero.")
    if batch.ndim != 4:
        raise ValueError(f"Batch ndim should be 4. Got {batch.ndim}")
    if target.ndim != 1:
        raise ValueError(f"Target ndim should be 1. Got {target.ndim}")
    if not jnp.issubdtype(batch.dtype, jnp.floating):
        raise TypeError(f"Batch dtype should be a float tensor. Got {batch.dtype}.")
    if not jnp.issubdtype(target.dtype, jnp.integer):
        # TODO(synk): torch checks for exactly int64; JAX commonly uses int32.
        raise TypeError(f"Target dtype should be an integer tensor. Got {target.dtype}")

    B, C, H, W = batch.shape
    N = C * H * W
    itemsize = jnp.dtype(batch.dtype).itemsize

    # ---- RNG glue (plain JAX): coin flip + Beta(alpha, alpha) lambda -------
    k_apply, k_lam = jax.random.split(key)
    apply_mix = jax.random.uniform(k_apply, ()) < p
    lam_raw = jax.random.beta(k_lam, alpha, alpha)     # Dirichlet([a, a])[0]
    # lam stays float32; lam = 1.0 reproduces the PyTorch early-return path.
    lam = jnp.where(apply_mix, lam_raw, 1.0).astype(jnp.float32).reshape(1)

    # ---- lane-dense image blend --------------------------------------------
    TN, R, TR = _choose_image_tiling(N, itemsize)
    xs = batch.reshape(B, R, TN)
    block_bytes = TR * TN * itemsize
    # Stay within the per-generation scoped-VMEM budget (v5e default 16 MiB,
    # v7x physical VMEM is only 64 MiB): cap the explicit limit at 32 MiB.
    vmem_limit = int(min(max(8 * block_bytes, 16 << 20), 32 << 20))

    out_img = pl.pallas_call(
        _mix_images_kernel,
        out_shape=jax.ShapeDtypeStruct((B, R, TN), batch.dtype),
        grid=(B, R // TR),
        in_specs=[
            # lam scalar lives in SMEM (replicated across the grid).
            pl.BlockSpec(memory_space=pltpu.MemorySpace.SMEM),
            # batch[b] chunk
            pl.BlockSpec((1, TR, TN), lambda b, r: (b, r, 0)),
            # batch[(b - 1) mod B] chunk -- roll(1, 0) via the index_map only.
            pl.BlockSpec((1, TR, TN), lambda b, r: ((b + B - 1) % B, r, 0)),
        ],
        out_specs=pl.BlockSpec((1, TR, TN), lambda b, r: (b, r, 0)),
        compiler_params=pltpu.CompilerParams(
            dimension_semantics=("parallel", "parallel"),
            vmem_limit_bytes=vmem_limit),
    )(lam, xs, xs).reshape(B, C, H, W)

    # ---- tiny one-hot target mix: one single-step pallas_call ---------------
    tgt2 = target.astype(jnp.int32).reshape(B, 1)
    tgt2_roll = jnp.roll(tgt2, 1, axis=0)

    out_tgt = pl.pallas_call(
        _mix_targets_kernel,
        out_shape=jax.ShapeDtypeStruct((B, num_classes), batch.dtype),
        grid=(1,),
        in_specs=[
            pl.BlockSpec(memory_space=pltpu.MemorySpace.SMEM),
            pl.BlockSpec((B, 1), lambda i: (0, 0)),
            pl.BlockSpec((B, 1), lambda i: (0, 0)),
        ],
        out_specs=pl.BlockSpec((B, num_classes), lambda i: (0, 0)),
        compiler_params=pltpu.CompilerParams(
            dimension_semantics=("arbitrary",)),
    )(lam, tgt2, tgt2_roll)

    return out_img, out_tgt


# ----------------------------- reference & test ---------------------------- #

def _reference(batch, target, key, *, num_classes, p, alpha):
    """Plain-JAX reference with identical RNG usage, for validation."""
    k_apply, k_lam = jax.random.split(key)
    apply_mix = jax.random.uniform(k_apply, ()) < p
    lam = jnp.where(apply_mix, jax.random.beta(k_lam, alpha, alpha),
                    1.0).astype(jnp.float32)
    oh = jax.nn.one_hot(target, num_classes, dtype=jnp.float32)
    xf = batch.astype(jnp.float32)
    b = (lam * xf + (1.0 - lam) * jnp.roll(xf, 1, axis=0)).astype(batch.dtype)
    t = (lam * oh + (1.0 - lam) * jnp.roll(oh, 1, axis=0)).astype(batch.dtype)
    return b, t


if __name__ == "__main__":
    B, C, H, W = 2, 4, 16, 16
    NUM_CLASSES = 10
    P, ALPHA = 0.5, 1.0

    key = jax.random.PRNGKey(0)
    k_data, k_tgt, k_mix = jax.random.split(key, 3)
    batch = jax.random.normal(k_data, (B, C, H, W), dtype=jnp.float32)
    target = jax.random.randint(k_tgt, (B,), 0, NUM_CLASSES, dtype=jnp.int32)

    out_img, out_tgt = random_mixup(batch, target, k_mix,
                                    num_classes=NUM_CLASSES, p=P, alpha=ALPHA)
    out_img = jax.block_until_ready(out_img)
    out_tgt = jax.block_until_ready(out_tgt)

    ref_img, ref_tgt = _reference(batch, target, k_mix,
                                  num_classes=NUM_CLASSES, p=P, alpha=ALPHA)
    assert out_img.shape == (B, C, H, W) and out_img.dtype == batch.dtype
    assert out_tgt.shape == (B, NUM_CLASSES) and out_tgt.dtype == batch.dtype
    assert jnp.allclose(out_img, ref_img, atol=1e-6, rtol=1e-6)
    assert jnp.allclose(out_tgt, ref_tgt, atol=1e-6, rtol=1e-6)

    print("KERNEL_OK")
</pallas_src>

<mosaic_0001>
module attributes {stable_mosaic.version = 11 : i64} {
  func.func @_mix_images_kernel(%arg0: i32, %arg1: i32, %arg2: memref<1xf32, #tpu.memory_space<smem>>, %arg3: memref<1x1x1024xf32, #tpu.memory_space<vmem>>, %arg4: memref<1x1x1024xf32, #tpu.memory_space<vmem>>, %arg5: memref<1x1x1024xf32, #tpu.memory_space<vmem>>) attributes {dimension_semantics = [#tpu.dimension_semantics<parallel>, #tpu.dimension_semantics<parallel>], iteration_bounds = array<i64: 2, 1>, scalar_prefetch = 0 : i64, scratch_operands = 0 : i64, tpu.core_type = #tpu.core_type<tc>, window_params = [{transform_indices = @transform_0, window_bounds = array<i64: 1>}, {transform_indices = @transform_1, window_bounds = array<i64: 1, 1, 1024>}, {transform_indices = @transform_2, window_bounds = array<i64: 1, 1, 1024>}, {transform_indices = @transform_3, window_bounds = array<i64: 1, 1, 1024>}]} {
    %c0 = arith.constant 0 : index
    %0 = memref.load %arg2[%c0] : memref<1xf32, #tpu.memory_space<smem>>
    %c0_0 = arith.constant 0 : index
    %c0_1 = arith.constant 0 : index
    %c0_2 = arith.constant 0 : index
    %1 = vector.load %arg3[%c0_0, %c0_1, %c0_2] : memref<1x1x1024xf32, #tpu.memory_space<vmem>>, vector<1x1x1024xf32>
    %c0_3 = arith.constant 0 : index
    %c0_4 = arith.constant 0 : index
    %c0_5 = arith.constant 0 : index
    %2 = vector.load %arg4[%c0_3, %c0_4, %c0_5] : memref<1x1x1024xf32, #tpu.memory_space<vmem>>, vector<1x1x1024xf32>
    %3 = vector.broadcast %0 : f32 to vector<1x1x1024xf32>
    %4 = arith.mulf %3, %1 : vector<1x1x1024xf32>
    %cst = arith.constant 1.000000e+00 : f32
    %5 = arith.subf %cst, %0 : f32
    %6 = vector.broadcast %5 : f32 to vector<1x1x1024xf32>
    %7 = arith.mulf %6, %2 : vector<1x1x1024xf32>
    %8 = arith.addf %4, %7 : vector<1x1x1024xf32>
    %c0_6 = arith.constant 0 : index
    %c0_7 = arith.constant 0 : index
    %c0_8 = arith.constant 0 : index
    %9 = vector.load %arg5[%c0_6, %c0_7, %c0_8] : memref<1x1x1024xf32, #tpu.memory_space<vmem>>, vector<1x1x1024xf32>
    tpu.vector_store %arg5[%c0_6, %c0_7, %c0_8], %8 {strides = array<i32>} : memref<1x1x1024xf32, #tpu.memory_space<vmem>>, vector<1x1x1024xf32>,
    return
  }
  func.func @transform_0(%arg0: i32, %arg1: i32) -> i32 {
    %c0_i32 = arith.constant 0 : i32
    %c0_i32_0 = arith.constant 0 : i32
    return %c0_i32 : i32
  }
  func.func @transform_1(%arg0: i32, %arg1: i32) -> (i32, i32, i32) {
    %c0_i32 = arith.constant 0 : i32
    %c0_i32_0 = arith.constant 0 : i32
    return %arg0, %arg1, %c0_i32 : i32, i32, i32
  }
  func.func @transform_2(%arg0: i32, %arg1: i32) -> (i32, i32, i32) {
    %c2_i32 = arith.constant 2 : i32
    %0 = arith.addi %arg0, %c2_i32 : i32
    %c1_i32 = arith.constant 1 : i32
    %1 = arith.subi %0, %c1_i32 : i32
    %c2_i32_0 = arith.constant 2 : i32
    %c0_i32 = arith.constant 0 : i32
    %2 = arith.cmpi eq, %c2_i32_0, %c0_i32 : i32
    %c1_i32_1 = arith.constant 1 : i32
    %3 = arith.select %2, %c1_i32_1, %c2_i32_0 : i32
    %4 = arith.remsi %1, %3 : i32
    %c0_i32_2 = arith.constant 0 : i32
    %5 = arith.cmpi ne, %4, %c0_i32_2 : i32
    %c0_i32_3 = arith.constant 0 : i32
    %6 = arith.cmpi slt, %4, %c0_i32_3 : i32
    %c0_i32_4 = arith.constant 0 : i32
    %7 = arith.cmpi slt, %3, %c0_i32_4 : i32
    %8 = arith.xori %6, %7 : i1
    %9 = arith.andi %8, %5 : i1
    %10 = arith.addi %4, %3 : i32
    %11 = arith.select %9, %10, %4 : i32
    %c0_i32_5 = arith.constant 0 : i32
    %c0_i32_6 = arith.constant 0 : i32
    return %11, %arg1, %c0_i32_5 : i32, i32, i32
  }
  func.func @transform_3(%arg0: i32, %arg1: i32) -> (i32, i32, i32) {
    %c0_i32 = arith.constant 0 : i32
    %c0_i32_0 = arith.constant 0 : i32
    return %arg0, %arg1, %c0_i32 : i32, i32, i32
  }
}

</mosaic_0001>

<bundles_post_ra>
// kernel: tpu_custom_call.1
= control target key start
LH: loop header
LB: loop body
LE: loop exit
PB: predicated region body
PF: predicated region fallthrough
CT: control target
= control target key end

     0   :  { %s996_s0 = inlined_call_operand.<no memory space> [shape: f32[1], index: 0, kind: input, shape index: {}]   ;;  %s997_s1 = inlined_call_operand.hbm [shape: f32[2,1,1024], index: 1, kind: input, shape index: {}]   ;;  %s998_s2 = inlined_call_operand.hbm [shape: f32[2,1,1024], index: 2, kind: input, shape index: {}]   ;;  %s999_s3 = inlined_call_operand.hbm [shape: f32[2,1,1024], index: 3, kind: output, shape index: {}]  }
   0x1   :  { %1006 = sst [smem:[#allocation13_spill]] %s997_s1 }
   0x2   :  { %8 = sst [smem:[#allocation2]] %s996_s0 }
   0x3   :  { %9 = vsyncpa [#allocation4], 0 }
   0x4   :  { %11 = vsyncpa [#allocation4 + $0x1], 0 }
   0x5   :  { %12 = vsyncpa [#allocation7], 0 }
   0x6   :  { %14 = vsyncpa [#allocation7 + $0x1], 0 }
   0x7   :  { %15 = vsyncpa [#allocation5], 0 }
   0x8   :  { %17 = vsyncpa [#allocation5 + $0x1], 0  ;;  %s751_s14 = smov 0   ;;  %s753_s15 = smov 0  }
   0x9   :  { %s755_s16 = smov 0   ;;  %s757_s17 = smov 0  }
   0xa   :  { %s759_s18 = smov 0   ;;  %s761_s19 = smov 0  }
   0xb   :  { %s763_s20 = smov 0   ;;  %s765_s0 = smov 0  }
   0xc   :  { %s767_s21 = smov 0  }
   0xd LB: > { %s437_s22 = sadd.s32 4294967295, %s723_s21   ;;  %s438_s23 = sadd.s32 4294967294, %s723_s21   ;;  %s723_s21 = sphi %s767_s21, %s23_s21   ;;  %s719_s0 = sphi %s765_s0, %s1035_s0   ;;  %s715_s20 = sphi %s763_s20, %s1034_s20   ;;  %s711_s19 = sphi %s761_s19, %s1033_s19   ;;  %s707_s18 = sphi %s759_s18, %s1032_s18   ;;  %s703_s17 = sphi %s757_s17, %s1031_s17   ;;  %s699_s16 = sphi %s755_s16, %s1030_s16   ;;  %s695_s15 = sphi %s753_s15, %s1029_s15   ;;  %s691_s14 = sphi %s751_s14, %s1028_s14  }
   0xe   : > { %s799_s24 = sadd.s32 1, %s719_s0  ;;  %s65_s25 = sadd.s32 1, %s711_s19 }
   0xf   : > { %p37_p0 = scmp.ge.s32.totalorder %s799_s24, 2  ;;  %p72_p1 = scmp.ne.s32.totalorder %s711_s19, %s707_s18 }
  0x10   : > { %p1001_p2 = scmp.eq.s32.totalorder %s723_s21, 0  ;;  %p78_p3 = scmp.ne.s32.totalorder %s707_s18, %s703_s17 }
  0x11   : > { %s809_s26 = scalar_select %p37_p0, 0, %s799_s24  }
  0x12   : > { %p816_p4 = por %p1001_p2, %p72_p1  ;;  %p820_p5 = scmp.eq.s32.totalorder %s437_s22, 0 }
  0x13   : > { %1007 = sst [smem:[#allocation12_spill]] %s809_s26  ;;  %s60_s29 = ssub.s32 %s719_s0, %s809_s26 }
  0x14   : > { %p63_p6 = scmp.eq.s32.totalorder %s60_s29, 0  ;;  %p831_p7 = por %p820_p5, %p78_p3 }
  0x15   : > { %s101_s4 = sadd.s32 1, %s809_s26  ;;  %p158_p8 = scmp.eq.s32.totalorder %s437_s22, 1 }
  0x16   : > { %s1010_s30 = scalar_select %p831_p7, 1, 0 }
  0x17   : > { %s837_s5 = scalar_select %p63_p6, %s711_s19, %s65_s25  }
  0x18   : > { %s103_s6 = ssub.s32 0, %s101_s4  ;;  %p842_p9 = por %p158_p8, %p72_p1 }
  0x19   : > { %s442_s7 = smin.u32 %s103_s6, %s101_s4  ;;  %p164_p10 = scmp.eq.s32.totalorder %s438_s23, 1 }
  0x1a   : > { %s1011_s8 = scalar_select %p842_p9, 1, 0 }
  0x1b   : > { %s846_s9 = sand.u32 1, %s442_s7   ;;  %p852_p12 = por %p164_p10, %p78_p3 }
  0x1c   : > { %p1002_p13 = scmp.lt.s32.totalorder %s723_s21, 2  ;;  %s187_s11 = sand.u32 1, %s711_s19  }
  0x1d   : > { %s1012_s10 = scalar_select %p852_p12, 1, 0 }
  0x1e   : > { %s465_s12 = sshll.u32 %s719_s0, 7  ;;  %s447_s13 = sshll.u32 %s187_s11, 3 }
  0x1f   : > { %s1013_s1 = sld [smem:[#allocation13_spill]]  ;;  %s191_s4 = scalar_lea.vmem [#allocation3], %s447_s13 }
  0x20   : > { %s201_s6 = sshll.u32 %s191_s4, 4  ;;  %p866_p0 = pnand %p1002_p13, %p816_p4  ;;  %s202_s6 = int_to_ptr.vmem [resolvable:$true] %s201_s6 }
  0x21   : > { %p456_p1 = scmp.ge.s32.totalorder %s723_s21, 1  ;;  %p240_p3 = scmp.lt.s32.totalorder %s723_s21, 3 }
  0x22   : > { %s188_s7 = scalar_lea.sflag [#allocation4], %s187_s11  ;;  %p561_p6 = pneg %p866_p0 }
  0x23   : > { %s572_s26 = scalar_lea.vmem %s202_s6, 128 }
  0x24   : > { %p573_p8 = scmp.ne.s32.totalorder %s202_s6, %s572_s26 }
  0x25   : > { %s199_s29 = scalar_lea.hbm %s1013_s1, %s465_s12  ;;  %s725_s12 = smov [#allocation3]  }
  0x26   : > { %p575_p10 = pnand %p573_p8, %p561_p6  ;;  %s577_s13 = sshll.u32 %s725_s12, 4  ;;  %s578_s13 = int_to_ptr.vmem [resolvable:$false] %s577_s13 }
  0x27   : > { %s579_s27 = scalar_lea.vmem %s578_s13, 256  ;;  %p580_p2 = scmp.lt.s32.totalorder %s202_s6, %s578_s13 }
  0x28   : > { %p576_p11 = pneg %p575_p10  ;;  %p581_p4 = scmp.lt.s32.totalorder %s579_s27, %s572_s26 }
  0x2a   : > { %p582_p13 = por %p581_p4, %p580_p2 }
  0x2c   : > { %p583_p12 = pnand %p582_p13, %p576_p11 }
  0x2e   : > { %586 = shalt.err (!%p583_p12)
}
  0x2f   : > { %477 = dma.hbm_to_vmem [thread:$0]  (!%p866_p0), %s199_s29, 128, %s202_s6, %s188_s7  }
  0x30   : > { %p880_p2 = pnand %p456_p1, %p240_p3  ;;  %s90_s11 = ssub.s32 0, %s799_s24 }
  0x31   : > { %s439_s22 = smin.u32 %s90_s11, %s799_s24  ;;  %s119_s25 = sadd.s32 1, %s699_s16 }
  0x32   : > { %s1015_s26 = scalar_select %p880_p2, 1, 0 }
  0x33   : > { %s92_s4 = sand.u32 1, %s439_s22   ;;  %p126_p11 = scmp.ne.s32.totalorder %s699_s16, %s695_s15 }
  0x34   : > { %p132_p12 = scmp.ne.s32.totalorder %s695_s15, %s691_s14  ;;  %p441_p13 = scmp.lt.s32.totalorder %s92_s4, 0 }
  0x35   : > { %s99_s23 = sadd.s32 2, %s92_s4  ;;  %p444_p6 = scmp.lt.s32.totalorder %s846_s9, 0 }
  0x36   : > { %s112_s12 = sadd.s32 2, %s846_s9  ;;  %s1037_s23 = smov (!%p441_p13, %s99_s23), %s92_s4 }
  0x37   : > { %s1039_s12 = smov (!%p444_p6, %s112_s12), %s846_s9  ;;  %p1016_p0 = scmp.eq.s32.totalorder %s723_s21, 0 }
  0x38   : > { %p898_p3 = por %p132_p12, %p820_p5  ;;  %s114_s24 = ssub.s32 %s1037_s23, %s1039_s12 }
  0x39   : > { %p128_p1 = por %p126_p11, %p1016_p0  ;;  %s208_s6 = sand.u32 1, %s699_s16  }
  0x3a   : > { %s1017_s29 = scalar_select %p898_p3, 1, 0 }
  0x3b   : > { %p117_p8 = scmp.eq.s32.totalorder %s114_s24, 0  ;;  %s450_s7 = sshll.u32 %s208_s6, 3 }
  0x3c   : > { %s466_s13 = sshll.u32 %s1037_s23, 7  ;;  %s212_s28 = scalar_lea.vmem [#allocation6], %s450_s7 }
  0x3d   : > { %s904_s14 = scalar_select %p117_p8, %s699_s16, %s119_s25  }
  0x3e   : > { %s909_s22 = scalar_lea.hbm %s998_s2, %s466_s13  ;;  %s235_s9 = sshll.u32 %s212_s28, 4  ;;  %s236_s9 = int_to_ptr.vmem [resolvable:$true] %s235_s9 }
  0x3f   : > { %p1018_p5 = scmp.lt.s32.totalorder %s723_s21, 2  ;;  %s209_s23 = scalar_lea.sflag [#allocation7], %s208_s6 }
  0x40   : > { %s587_s25 = scalar_lea.hbm %s909_s22, 128  ;;  %s592_s13 = scalar_lea.hbm %s998_s2, 256 }
  0x41   : > { %p913_p10 = pnand %p1018_p5, %p128_p1  ;;  %p588_p4 = scmp.ne.s32.totalorder %s909_s22, %s587_s25 }
  0x42   : > { %p593_p6 = scmp.lt.s32.totalorder %s909_s22, %s998_s2  ;;  %p594_p0 = scmp.lt.s32.totalorder %s592_s13, %s587_s25 }
  0x43   : > { %p589_p11 = pneg %p913_p10 }
  0x44   : > { %p595_p1 = por %p594_p0, %p593_p6 }
  0x45   : > { %p590_p12 = pnand %p589_p11, %p588_p4 }
  0x47   : > { %p591_p13 = pneg %p590_p12 }
  0x49   : > { %p596_p8 = pnand %p595_p1, %p591_p13 }
  0x4b   : > { %599 = shalt.err (!%p596_p8)
}
  0x4c   : > { %s600_s11 = scalar_lea.vmem %s236_s9, 128  ;;  %s726_s6 = smov [#allocation6]  }
  0x4d   : > { %p601_p5 = scmp.ne.s32.totalorder %s236_s9, %s600_s11  ;;  %s605_s28 = sshll.u32 %s726_s6, 4  ;;  %s606_s28 = int_to_ptr.vmem [resolvable:$false] %s605_s28 }
  0x4e   : > { %s607_s1 = scalar_lea.vmem %s606_s28, 256  ;;  %p608_p4 = scmp.lt.s32.totalorder %s236_s9, %s606_s28 }
  0x4f   : > { %p603_p9 = pnand %p601_p5, %p589_p11  ;;  %p609_p12 = scmp.lt.s32.totalorder %s607_s1, %s600_s11 }
  0x51   : > { %p604_p3 = pneg %p603_p9  ;;  %p610_p7 = por %p609_p12, %p608_p4 }
  0x53   : > { %p611_p2 = pnand %p610_p7, %p604_p3 }
  0x55   : > { %614 = shalt.err (!%p611_p2)
}
  0x56   : > { %480 = dma.hbm_to_vmem [thread:$0]  (!%p913_p10), %s909_s22, 128, %s236_s9, %s209_s23  }
  0x57   : > { %p1020_p13 = scmp.ne.s32.totalorder %s1015_s26, 0 }
  0x58   : > { %s934_s25 = sand.u32 (!%p1020_p13), 1, %s707_s18   ;;  %p1021_p9 = scmp.ne.s32.totalorder (!%p1020_p13), %s1010_s30, 0 }
  0x59   : > { %244 = sbr.rel (%p1020_p13) target bundleno = 125 (0x7d), region = 32  ;;  %s457_s12 = sshll.u32 (!%p1020_p13), %s934_s25, 3 }
  0x5a   : > { %s247_s24 = scalar_lea.sflag (!%p1020_p13), [#allocation4], %s934_s25  ;;  %s250_s13 = scalar_lea.vmem (!%p1020_p13), [#allocation3], %s457_s12 }
  0x5e   : > { %678 = dma.done.wait (%p1021_p9), %s247_s24, 128  }
  0x5f   : > { %680 = vsyncadd (%p1021_p9), %s247_s24, 4294967168  ;;  %s255_s1 = sand.u32 1, %s695_s15   ;;  %p1022_p7 = scmp.ne.s32.totalorder %s1017_s29, 0 }
  0x60   : > { %s458_s22 = sshll.u32 %s255_s1, 3  ;;  %s256_s26 = scalar_lea.sflag [#allocation7], %s255_s1 }
  0x61   : > { %s259_s9 = scalar_lea.vmem [#allocation6], %s458_s22 }
  0x62   : > { %682 = dma.done.wait (%p1022_p7), %s256_s26, 128  }
  0x63   : > { %684 = vsyncadd (%p1022_p7), %s256_s26, 4294967168  ;;  %s300_s4 = sld [smem:[#allocation2]]  ;;  %v301_v0 = vld [vmem:[%s250_s13] sm:$0xff]  ;;  %v302_v1 = vld [vmem:[%s259_s9] sm:$0xff]  ;;  %s286_s23 = scalar_lea.vmem [#allocation8], %s457_s12 }
  0x64   : > { %s327_s7 = sshll.u32 %s286_s23, 4  ;;  %s467_s27 = sshll.u32 %s715_s20, 7  ;;  %s328_s7 = int_to_ptr.vmem [resolvable:$true] %s327_s7 }
  0x65   : > { %s325_s29 = scalar_lea.hbm %s999_s3, %s467_s27  ;;  %s311_s28 = scalar_lea.sflag [#allocation5], %s934_s25 }
  0x66   : > { %s615_s24 = scalar_lea.vmem %s328_s7, 128  ;;  %p1023_p3 = scmp.ne.s32.totalorder %s1011_s8, 0 }
  0x67   : > { %p616_p2 = scmp.ne.s32.totalorder %s328_s7, %s615_s24  ;;  %s727_s13 = smov [#allocation8]  }
  0x68   : > { %s619_s1 = sshll.u32 %s727_s13, 4  ;;  %s620_s1 = int_to_ptr.vmem [resolvable:$false] %s619_s1 }
  0x69   : > { %v303_v2 = vstv %s300_s4  ;;  %s305_s30 = ssub.f32 1.0, %s300_s4  ;;  %p617_p10 = pnand %p616_p2, %p1023_p3 }
  0x6a   : > { %v304_v3 = vmul.f32 %v303_v2, %v301_v0  ;;  %s621_s12 = scalar_lea.vmem %s620_s1, 256  ;;  %p622_p6 = scmp.lt.s32.totalorder %s328_s7, %s620_s1 }
  0x6b   : > { %v306_v4 = vstv %s305_s30  ;;  %p618_p11 = pneg %p617_p10  ;;  %p623_p0 = scmp.lt.s32.totalorder %s621_s12, %s615_s24 }
  0x6c   : > { %v307_v5 = vmul.f32 %v306_v4, %v302_v1 }
  0x6d   : > { %p624_p1 = por %p623_p0, %p622_p6 }
  0x6e   : > { %v308_v6 = vadd.f32 %v307_v5, %v304_v3 }
  0x6f   : > { %p625_p8 = pnand %p624_p1, %p618_p11 }
  0x70   : > { %309 = vst [vmem:[%s286_s23] sm:$0xff] %v308_v6 }
  0x71   : > { %628 = shalt.err (!%p625_p8)
}
  0x72   : > { %s629_s20 = scalar_lea.hbm %s325_s29, 128  ;;  %s633_s26 = scalar_lea.hbm %s999_s3, 256 }
  0x73   : > { %p630_p5 = scmp.ne.s32.totalorder %s325_s29, %s629_s20  ;;  %p634_p13 = scmp.lt.s32.totalorder %s325_s29, %s999_s3 }
  0x74   : > { %p635_p9 = scmp.lt.s32.totalorder %s633_s26, %s629_s20 }
  0x75   : > { %p631_p4 = pnand %p630_p5, %p1023_p3 }
  0x76   : > { %p636_p7 = por %p635_p9, %p634_p13 }
  0x77   : > { %p632_p12 = pneg %p631_p4 }
  0x79   : > { %p637_p2 = pnand %p636_p7, %p632_p12 }
  0x7b   : > { %640 = shalt.err (!%p637_p2)
}
  0x7c   : > { %472 = dma.vmem_to_hbm [thread:$0]  (%p1023_p3), %s328_s7, 128, %s325_s29, %s311_s28  }
  0x7d PF: > { %s339_s30 = sand.u32 1, %s703_s17   ;;  %p1024_p10 = scmp.ne.s32.totalorder %s1012_s10, 0 }
  0x7e   : > { %p1025_p11 = scmp.ge.s32.totalorder %s723_s21, 2  ;;  %s340_s23 = scalar_lea.sflag [#allocation5], %s339_s30 }
  0x80   : > { %p482_p6 = pnand %p1025_p11, %p1024_p10 }
  0x82   : > { %p483_p0 = pneg %p482_p6 }
  0x84   : > { %686 = dma.done.wait (%p483_p0), %s340_s23, 128  }
  0x85   : > { %688 = vsyncadd (%p483_p0), %s340_s23, 4294967168  ;;  %s23_s21 = sadd.s32 1, %s723_s21   ;;  %s1026_s27 = smov %s904_s14 }
  0x86   : > { %p20_p1 = scmp.ge.s32.totalorder %s23_s21, 4   ;;  %s1027_s8 = sld [smem:[#allocation12_spill]] }
  0x87   : > { %s1028_s14 = smov %s695_s15  ;;  %s1029_s15 = smov %s699_s16 }
  0x88   : > { %s1030_s16 = smov %s1026_s27  ;;  %s1031_s17 = smov %s707_s18 }
  0x89   : > { %s1032_s18 = smov %s711_s19  ;;  %s1033_s19 = smov %s837_s5 }
  0x8a   : > { %s1034_s20 = smov %s719_s0  ;;  %22 = sbr.rel (!%p20_p1) target bundleno = 13 (0xd), region = 90 }
  0x8c   : > { %s1035_s0 = smov %s1027_s8 }
  0x8f   :  { %345 = vsyncpa [#allocation4], 1 }
  0x90   :  { %347 = vsyncpa [#allocation4 + $0x1], 1 }
  0x91   :  { %348 = vsyncpa [#allocation7], 1 }
  0x92   :  { %350 = vsyncpa [#allocation7 + $0x1], 1 }
  0x93   :  { %351 = vsyncpa [#allocation5], 1 }
  0x94   :  { %353 = vsyncpa [#allocation5 + $0x1], 1 }

</bundles_post_ra>
